<compile_context>
chip_gen: v7x
topology: tpu7x:2x2x1
jax: 0.10.0
libtpu: 0.0.40
codegen_flags: <defaults>
</compile_context>

<pallas_src>
import functools

import jax
import jax.numpy as jnp
from jax.experimental import pallas as pl
from jax.experimental.pallas import tpu as pltpu


def attention_kernel(x_ref, wq_ref, bq_ref, wk_ref, bk_ref, wv_ref, bv_ref,
                     wo_ref, bo_ref, gamma_ref, beta_ref, out_ref, acc_ref,
                     *, batches_per_block, seq_len, head_dim):
    """Grid = (row_blocks, heads). One step = one head's contribution to one
    row block (batches_per_block whole batches = batches_per_block*seq_len rows)."""
    h = pl.program_id(1)
    num_heads = pl.num_programs(1)

    @pl.when(h == 0)
    def _init():
        acc_ref[...] = jnp.zeros_like(acc_ref)

    x = x_ref[...]                                    # (TM, D) f32
    x_bf = x.astype(jnp.bfloat16)

    # --- per-head QKV projections: bf16 operands on the MXU, f32 accumulation ---
    q = jnp.dot(x_bf, wq_ref[0], preferred_element_type=jnp.float32) + bq_ref[0]
    k = jnp.dot(x_bf, wk_ref[0], preferred_element_type=jnp.float32) + bk_ref[0]
    v = jnp.dot(x_bf, wv_ref[0], preferred_element_type=jnp.float32) + bv_ref[0]

    q = q * (1.0 / (head_dim ** 0.5))                 # fold the softmax scale into q

    bb, s_len, hd = batches_per_block, seq_len, head_dim
    qb = q.reshape(bb, s_len, hd).astype(jnp.bfloat16)
    kb = k.reshape(bb, s_len, hd).astype(jnp.bfloat16)
    vb = v.reshape(bb, s_len, hd).astype(jnp.bfloat16)

    # --- scaled dot-product attention, batched over the batches in this block ---
    # TODO(synk): for large S, tile this flash-style (online softmax over KV
    # blocks with m/l/acc scratch) so the (S, S) scores never fully materialize
    # (v7x 64 MiB VMEM).
    scores = jnp.einsum('bqd,bkd->bqk', qb, kb,
                        preferred_element_type=jnp.float32)           # (bb, S, S) f32
    scores = scores - jnp.max(scores, axis=-1, keepdims=True)
    p = jnp.exp(scores)                                               # f32, EUP
    p = p * pl.reciprocal(jnp.sum(p, axis=-1, keepdims=True), approx=True)

    o = jnp.einsum('bqk,bkd->bqd', p.astype(jnp.bfloat16), vb,
                   preferred_element_type=jnp.float32)                # (bb, S, hd)
    o = o.reshape(bb * s_len, hd)

    # --- this head's slice of the output projection, accumulated in f32 ---
    acc_ref[...] += jnp.dot(o.astype(jnp.bfloat16), wo_ref[0],
                            preferred_element_type=jnp.float32)

    # --- epilogue on the last head: bias + residual + LayerNorm (f32) ---
    @pl.when(h == num_heads - 1)
    def _finalize():
        y = acc_ref[...] + bo_ref[...] + x
        mean = jnp.mean(y, axis=-1, keepdims=True)
        var = jnp.mean((y - mean) * (y - mean), axis=-1, keepdims=True)
        y_n = (y - mean) * jax.lax.rsqrt(var + 1e-5)
        # Note: D=32 < 128 lanes is inherent to this module -> masked stores on
        # the epilogue; for real models make D a multiple of 128 (lane-dense out).
        out_ref[...] = (y_n * gamma_ref[...] + beta_ref[...]).astype(out_ref.dtype)


def attention_module(x, params, *, num_heads):
    """params = (wq, bq, wk, bk, wv, bv, wo, bo, gamma, beta).
    Weights are (D, D) laid out as (in, out); biases/gamma/beta are (1, D)."""
    wq, bq, wk, bk, wv, bv, wo, bo, gamma, beta = params
    B, S, D = x.shape
    hd = D // num_heads
    assert hd * num_heads == D, "dim must be divisible by num_heads"

    # ---- wrapper-side layout plumbing (plain JAX, outside the kernel) ----
    xf = x.reshape(B * S, D)                                   # flatten rows

    def split_w_cols(w):   # (D, D) -> (H, D, hd): per-head output-column tiles
        return w.reshape(D, num_heads, hd).transpose(1, 0, 2).astype(jnp.bfloat16)

    def split_b(b):        # (1, D) -> (H, 1, hd), keep f32
        return b.reshape(num_heads, hd)[:, None, :]

    wq_h, wk_h, wv_h = split_w_cols(wq), split_w_cols(wk), split_w_cols(wv)
    bq_h, bk_h, bv_h = split_b(bq), split_b(bk), split_b(bv)
    wo_h = wo.reshape(num_heads, hd, D).astype(jnp.bfloat16)   # per-head row tiles

    # Pack whole batches per row block, targeting ~256 rows (MXU-sized M tile).
    target_rows = 256
    bb = 1
    for cand in range(1, B + 1):
        if B % cand == 0 and cand * S <= max(target_rows, S):
            bb = cand
    tm = bb * S
    n_row_blocks = B // bb

    kernel = functools.partial(attention_kernel, batches_per_block=bb,
                               seq_len=S, head_dim=hd)

    out_flat = pl.pallas_call(
        kernel,
        out_shape=jax.ShapeDtypeStruct((B * S, D), x.dtype),
        grid=(n_row_blocks, num_heads),
        in_specs=[
            pl.BlockSpec((tm, D), lambda i, h: (i, 0)),        # x rows (resident per i)
            pl.BlockSpec((1, D, hd), lambda i, h: (h, 0, 0)),  # wq head tile
            pl.BlockSpec((1, 1, hd), lambda i, h: (h, 0, 0)),  # bq head tile
            pl.BlockSpec((1, D, hd), lambda i, h: (h, 0, 0)),  # wk
            pl.BlockSpec((1, 1, hd), lambda i, h: (h, 0, 0)),  # bk
            pl.BlockSpec((1, D, hd), lambda i, h: (h, 0, 0)),  # wv
            pl.BlockSpec((1, 1, hd), lambda i, h: (h, 0, 0)),  # bv
            pl.BlockSpec((1, hd, D), lambda i, h: (h, 0, 0)),  # wo head tile
            pl.BlockSpec((1, D), lambda i, h: (0, 0)),         # bo
            pl.BlockSpec((1, D), lambda i, h: (0, 0)),         # gamma
            pl.BlockSpec((1, D), lambda i, h: (0, 0)),         # beta
        ],
        out_specs=pl.BlockSpec((tm, D), lambda i, h: (i, 0)),
        scratch_shapes=[pltpu.VMEM((tm, D), jnp.float32)],     # f32 accumulator
        compiler_params=pltpu.CompilerParams(
            dimension_semantics=("parallel", "arbitrary"),
            vmem_limit_bytes=32 * 1024 * 1024),
    )(xf, wq_h, bq_h, wk_h, bk_h, wv_h, bv_h, wo_h, bo, gamma, beta)

    return out_flat.reshape(B, S, D)


def _reference(x, params, *, num_heads):
    """Pure-JAX f32 reference mirroring the PyTorch forward exactly."""
    wq, bq, wk, bk, wv, bv, wo, bo, gamma, beta = params
    B, S, D = x.shape
    hd = D // num_heads

    q = x @ wq + bq
    k = x @ wk + bk
    v = x @ wv + bv

    def split(t):  # (B, S, D) -> (B, H, S, hd)
        return t.reshape(B, S, num_heads, hd).transpose(0, 2, 1, 3)

    q, k, v = split(q), split(k), split(v)
    s = jnp.einsum('bhqd,bhkd->bhqk', q, k) / (hd ** 0.5)
    p = jax.nn.softmax(s, axis=-1)
    o = jnp.einsum('bhqk,bhkd->bhqd', p, v)
    o = o.transpose(0, 2, 1, 3).reshape(B, S, D)

    y = o @ wo + bo + x
    mean = jnp.mean(y, axis=-1, keepdims=True)
    var = jnp.mean((y - mean) ** 2, axis=-1, keepdims=True)
    return (y - mean) * jax.lax.rsqrt(var + 1e-5) * gamma + beta


if __name__ == "__main__":
    B, S, D, H = 2, 8, 32, 8

    key = jax.random.PRNGKey(0)
    keys = jax.random.split(key, 10)

    x = jax.random.normal(keys[0], (B, S, D), dtype=jnp.float32)

    # Deterministic parameter init (uniform, nn.Linear-style scale); weights
    # are stored directly in (in, out) layout.
    bound = 1.0 / (D ** 0.5)
    def u(k, shape):
        return jax.random.uniform(k, shape, jnp.float32, -bound, bound)

    wq, bq = u(keys[1], (D, D)), u(keys[2], (1, D))
    wk, bk = u(keys[3], (D, D)), u(keys[4], (1, D))
    wv, bv = u(keys[5], (D, D)), u(keys[6], (1, D))
    wo, bo = u(keys[7], (D, D)), u(keys[8], (1, D))
    gamma = jnp.ones((1, D), jnp.float32)
    beta = jnp.zeros((1, D), jnp.float32)

    params = (wq, bq, wk, bk, wv, bv, wo, bo, gamma, beta)

    out = attention_module(x, params, num_heads=H)
    out = jax.block_until_ready(out)

    ref = _reference(x, params, num_heads=H)
    assert out.shape == (B, S, D)
    # Tolerance accounts for bf16 MXU operands (f32 accumulation) vs f32 reference.
    assert jnp.allclose(out, ref, atol=5e-2, rtol=5e-2), "mismatch vs reference"

    print("KERNEL_OK")
</pallas_src>

<mosaic_0001>
module attributes {stable_mosaic.version = 11 : i64} {
  func.func @attention_kernel(%arg0: i32, %arg1: i32, %arg2: memref<16x32xf32, #tpu.memory_space<vmem>>, %arg3: memref<1x32x4xbf16, #tpu.memory_space<vmem>>, %arg4: memref<1x1x4xf32, #tpu.memory_space<vmem>>, %arg5: memref<1x32x4xbf16, #tpu.memory_space<vmem>>, %arg6: memref<1x1x4xf32, #tpu.memory_space<vmem>>, %arg7: memref<1x32x4xbf16, #tpu.memory_space<vmem>>, %arg8: memref<1x1x4xf32, #tpu.memory_space<vmem>>, %arg9: memref<1x4x32xbf16, #tpu.memory_space<vmem>>, %arg10: memref<1x32xf32, #tpu.memory_space<vmem>>, %arg11: memref<1x32xf32, #tpu.memory_space<vmem>>, %arg12: memref<1x32xf32, #tpu.memory_space<vmem>>, %arg13: memref<16x32xf32, #tpu.memory_space<vmem>>, %arg14: memref<16x32xf32, #tpu.memory_space<vmem>>) attributes {dimension_semantics = [#tpu.dimension_semantics<parallel>, #tpu.dimension_semantics<arbitrary>], iteration_bounds = array<i64: 1, 8>, scalar_prefetch = 0 : i64, scratch_operands = 1 : i64, tpu.core_type = #tpu.core_type<tc>, window_params = [{transform_indices = @transform_0, window_bounds = array<i64: 16, 32>}, {transform_indices = @transform_1, window_bounds = array<i64: 1, 32, 4>}, {transform_indices = @transform_2, window_bounds = array<i64: 1, 1, 4>}, {transform_indices = @transform_3, window_bounds = array<i64: 1, 32, 4>}, {transform_indices = @transform_4, window_bounds = array<i64: 1, 1, 4>}, {transform_indices = @transform_5, window_bounds = array<i64: 1, 32, 4>}, {transform_indices = @transform_6, window_bounds = array<i64: 1, 1, 4>}, {transform_indices = @transform_7, window_bounds = array<i64: 1, 4, 32>}, {pipeline_mode = #tpu.pipeline_mode<synchronous>, transform_indices = @transform_8, window_bounds = array<i64: 1, 32>}, {pipeline_mode = #tpu.pipeline_mode<synchronous>, transform_indices = @transform_9, window_bounds = array<i64: 1, 32>}, {pipeline_mode = #tpu.pipeline_mode<synchronous>, transform_indices = @transform_10, window_bounds = array<i64: 1, 32>}, {transform_indices = @transform_11, window_bounds = array<i64: 16, 32>}]} {
    %c0_i32 = arith.constant 0 : i32
    %0 = arith.cmpi eq, %arg1, %c0_i32 : i32
    %1 = arith.extui %0 : i1 to i32
    %c0_i32_0 = arith.constant 0 : i32
    %2 = arith.cmpi ne, %1, %c0_i32_0 : i32
    scf.if %2 {
      %cst_36 = arith.constant 0.000000e+00 : f32
      %58 = vector.broadcast %cst_36 : f32 to vector<16x32xf32>
      %c0_37 = arith.constant 0 : index
      %c0_38 = arith.constant 0 : index
      %59 = vector.load %arg14[%c0_37, %c0_38] : memref<16x32xf32, #tpu.memory_space<vmem>>, vector<16x32xf32>
      tpu.vector_store %arg14[%c0_37, %c0_38], %58 {strides = array<i32>} : memref<16x32xf32, #tpu.memory_space<vmem>>, vector<16x32xf32>,
    } else {
    }
    %c0 = arith.constant 0 : index
    %c0_1 = arith.constant 0 : index
    %3 = vector.load %arg2[%c0, %c0_1] : memref<16x32xf32, #tpu.memory_space<vmem>>, vector<16x32xf32>
    %4 = arith.truncf %3 : vector<16x32xf32> to vector<16x32xbf16>
    %c0_2 = arith.constant 0 : index
    %c0_3 = arith.constant 0 : index
    %c0_4 = arith.constant 0 : index
    %5 = vector.load %arg3[%c0_2, %c0_3, %c0_4] : memref<1x32x4xbf16, #tpu.memory_space<vmem>>, vector<1x32x4xbf16>
    %6 = vector.shape_cast %5 : vector<1x32x4xbf16> to vector<32x4xbf16>
    %cst = arith.constant dense<0.000000e+00> : vector<16x4xf32>
    %7 = tpu.matmul %4, %6, %cst {dimension_numbers = #tpu.dot_dimension_numbers<[1], [0], [0], [1], [0, 0, 1, 1], [], []>} : vector<16x32xbf16>, vector<32x4xbf16>, vector<16x4xf32> -> vector<16x4xf32>
    %c0_5 = arith.constant 0 : index
    %c0_6 = arith.constant 0 : index
    %c0_7 = arith.constant 0 : index
    %8 = vector.load %arg4[%c0_5, %c0_6, %c0_7] : memref<1x1x4xf32, #tpu.memory_space<vmem>>, vector<1x1x4xf32>
    %9 = vector.shape_cast %8 : vector<1x1x4xf32> to vector<1x4xf32>
    %10 = vector.broadcast %9 : vector<1x4xf32> to vector<16x4xf32>
    %11 = arith.addf %7, %10 : vector<16x4xf32>
    %c0_8 = arith.constant 0 : index
    %c0_9 = arith.constant 0 : index
    %c0_10 = arith.constant 0 : index
    %12 = vector.load %arg5[%c0_8, %c0_9, %c0_10] : memref<1x32x4xbf16, #tpu.memory_space<vmem>>, vector<1x32x4xbf16>
    %13 = vector.shape_cast %12 : vector<1x32x4xbf16> to vector<32x4xbf16>
    %cst_11 = arith.constant dense<0.000000e+00> : vector<16x4xf32>
    %14 = tpu.matmul %4, %13, %cst_11 {dimension_numbers = #tpu.dot_dimension_numbers<[1], [0], [0], [1], [0, 0, 1, 1], [], []>} : vector<16x32xbf16>, vector<32x4xbf16>, vector<16x4xf32> -> vector<16x4xf32>
    %c0_12 = arith.constant 0 : index
    %c0_13 = arith.constant 0 : index
    %c0_14 = arith.constant 0 : index
    %15 = vector.load %arg6[%c0_12, %c0_13, %c0_14] : memref<1x1x4xf32, #tpu.memory_space<vmem>>, vector<1x1x4xf32>
    %16 = vector.shape_cast %15 : vector<1x1x4xf32> to vector<1x4xf32>
    %17 = vector.broadcast %16 : vector<1x4xf32> to vector<16x4xf32>
    %18 = arith.addf %14, %17 : vector<16x4xf32>
    %c0_15 = arith.constant 0 : index
    %c0_16 = arith.constant 0 : index
    %c0_17 = arith.constant 0 : index
    %19 = vector.load %arg7[%c0_15, %c0_16, %c0_17] : memref<1x32x4xbf16, #tpu.memory_space<vmem>>, vector<1x32x4xbf16>
    %20 = vector.shape_cast %19 : vector<1x32x4xbf16> to vector<32x4xbf16>
    %cst_18 = arith.constant dense<0.000000e+00> : vector<16x4xf32>
    %21 = tpu.matmul %4, %20, %cst_18 {dimension_numbers = #tpu.dot_dimension_numbers<[1], [0], [0], [1], [0, 0, 1, 1], [], []>} : vector<16x32xbf16>, vector<32x4xbf16>, vector<16x4xf32> -> vector<16x4xf32>
    %c0_19 = arith.constant 0 : index
    %c0_20 = arith.constant 0 : index
    %c0_21 = arith.constant 0 : index
    %22 = vector.load %arg8[%c0_19, %c0_20, %c0_21] : memref<1x1x4xf32, #tpu.memory_space<vmem>>, vector<1x1x4xf32>
    %23 = vector.shape_cast %22 : vector<1x1x4xf32> to vector<1x4xf32>
    %24 = vector.broadcast %23 : vector<1x4xf32> to vector<16x4xf32>
    %25 = arith.addf %21, %24 : vector<16x4xf32>
    %cst_22 = arith.constant 5.000000e-01 : f32
    %26 = vector.broadcast %cst_22 : f32 to vector<16x4xf32>
    %27 = arith.mulf %11, %26 : vector<16x4xf32>
    %28 = vector.shape_cast %27 : vector<16x4xf32> to vector<2x8x4xf32>
    %29 = arith.truncf %28 : vector<2x8x4xf32> to vector<2x8x4xbf16>
    %30 = vector.shape_cast %18 : vector<16x4xf32> to vector<2x8x4xf32>
    %31 = arith.truncf %30 : vector<2x8x4xf32> to vector<2x8x4xbf16>
    %32 = vector.shape_cast %25 : vector<16x4xf32> to vector<2x8x4xf32>
    %33 = arith.truncf %32 : vector<2x8x4xf32> to vector<2x8x4xbf16>
    "tpu.trace_start"() <{level = 10 : i32, message = "bqd,bkd->bqk"}> : () -> ()
    %cst_23 = arith.constant dense<0.000000e+00> : vector<2x8x8xf32>
    %34 = tpu.matmul %29, %31, %cst_23 {dimension_numbers = #tpu.dot_dimension_numbers<[2], [2], [1], [1], [0, 0, 0, 1, 1, 1], [0], [0]>} : vector<2x8x4xbf16>, vector<2x8x4xbf16>, vector<2x8x8xf32> -> vector<2x8x8xf32>
    "tpu.trace_stop"() : () -> ()
    %cst_24 = arith.constant dense<0xFF800000> : vector<2x8xf32>
    %35 = vector.multi_reduction <maximumf>, %34, %cst_24 [2] : vector<2x8x8xf32> to vector<2x8xf32>
    %36 = vector.shape_cast %35 : vector<2x8xf32> to vector<2x8x1xf32>
    %37 = vector.broadcast %36 : vector<2x8x1xf32> to vector<2x8x8xf32>
    %38 = arith.subf %34, %37 : vector<2x8x8xf32>
    %39 = math.exp %38 : vector<2x8x8xf32>
    %cst_25 = arith.constant dense<0.000000e+00> : vector<2x8xf32>
    %40 = vector.multi_reduction <add>, %39, %cst_25 [2] : vector<2x8x8xf32> to vector<2x8xf32>
    %41 = vector.shape_cast %40 : vector<2x8xf32> to vector<2x8x1xf32>
    %42 = tpu.reciprocal %41 {approx = true} : vector<2x8x1xf32> -> vector<2x8x1xf32>
    %43 = vector.broadcast %42 : vector<2x8x1xf32> to vector<2x8x8xf32>
    %44 = arith.mulf %39, %43 : vector<2x8x8xf32>
    %45 = arith.truncf %44 : vector<2x8x8xf32> to vector<2x8x8xbf16>
    "tpu.trace_start"() <{level = 10 : i32, message = "bqk,bkd->bqd"}> : () -> ()
    %cst_26 = arith.constant dense<0.000000e+00> : vector<2x8x4xf32>
    %46 = tpu.matmul %45, %33, %cst_26 {dimension_numbers = #tpu.dot_dimension_numbers<[2], [1], [1], [2], [0, 0, 0, 1, 1, 2], [0], [0]>} : vector<2x8x8xbf16>, vector<2x8x4xbf16>, vector<2x8x4xf32> -> vector<2x8x4xf32>
    "tpu.trace_stop"() : () -> ()
    %47 = vector.shape_cast %46 : vector<2x8x4xf32> to vector<16x4xf32>
    %c0_27 = arith.constant 0 : index
    %c0_28 = arith.constant 0 : index
    %48 = vector.load %arg14[%c0_27, %c0_28] : memref<16x32xf32, #tpu.memory_space<vmem>>, vector<16x32xf32>
    %49 = arith.truncf %47 : vector<16x4xf32> to vector<16x4xbf16>
    %c0_29 = arith.constant 0 : index
    %c0_30 = arith.constant 0 : index
    %c0_31 = arith.constant 0 : index
    %50 = vector.load %arg9[%c0_29, %c0_30, %c0_31] : memref<1x4x32xbf16, #tpu.memory_space<vmem>>, vector<1x4x32xbf16>
    %51 = vector.shape_cast %50 : vector<1x4x32xbf16> to vector<4x32xbf16>
    %cst_32 = arith.constant dense<0.000000e+00> : vector<16x32xf32>
    %52 = tpu.matmul %49, %51, %cst_32 {dimension_numbers = #tpu.dot_dimension_numbers<[1], [0], [0], [1], [0, 0, 1, 1], [], []>} : vector<16x4xbf16>, vector<4x32xbf16>, vector<16x32xf32> -> vector<16x32xf32>
    %53 = arith.addf %48, %52 : vector<16x32xf32>
    %c0_33 = arith.constant 0 : index
    %c0_34 = arith.constant 0 : index
    %54 = vector.load %arg14[%c0_33, %c0_34] : memref<16x32xf32, #tpu.memory_space<vmem>>, vector<16x32xf32>
    tpu.vector_store %arg14[%c0_33, %c0_34], %53 {strides = array<i32>} : memref<16x32xf32, #tpu.memory_space<vmem>>, vector<16x32xf32>,
    %c7_i32 = arith.constant 7 : i32
    %55 = arith.cmpi eq, %arg1, %c7_i32 : i32
    %56 = arith.extui %55 : i1 to i32
    %c0_i32_35 = arith.constant 0 : i32
    %57 = arith.cmpi ne, %56, %c0_i32_35 : i32
    scf.if %57 {
      %c0_36 = arith.constant 0 : index
      %c0_37 = arith.constant 0 : index
      %58 = vector.load %arg14[%c0_36, %c0_37] : memref<16x32xf32, #tpu.memory_space<vmem>>, vector<16x32xf32>
      %c0_38 = arith.constant 0 : index
      %c0_39 = arith.constant 0 : index
      %59 = vector.load %arg10[%c0_38, %c0_39] : memref<1x32xf32, #tpu.memory_space<vmem>>, vector<1x32xf32>
      %60 = vector.broadcast %59 : vector<1x32xf32> to vector<16x32xf32>
      %61 = arith.addf %58, %60 : vector<16x32xf32>
      %62 = arith.addf %61, %3 : vector<16x32xf32>
      %cst_40 = arith.constant dense<0.000000e+00> : vector<16xf32>
      %63 = vector.multi_reduction <add>, %62, %cst_40 [1] : vector<16x32xf32> to vector<16xf32>
      %64 = vector.shape_cast %63 : vector<16xf32> to vector<16x1xf32>
      %cst_41 = arith.constant 3.200000e+01 : f32
      %65 = vector.broadcast %cst_41 : f32 to vector<16x1xf32>
      %66 = arith.divf %64, %65 : vector<16x1xf32>
      %67 = vector.broadcast %66 : vector<16x1xf32> to vector<16x32xf32>
      %68 = arith.subf %62, %67 : vector<16x32xf32>
      %69 = vector.broadcast %66 : vector<16x1xf32> to vector<16x32xf32>
      %70 = arith.subf %62, %69 : vector<16x32xf32>
      %71 = arith.mulf %68, %70 : vector<16x32xf32>
      %cst_42 = arith.constant dense<0.000000e+00> : vector<16xf32>
      %72 = vector.multi_reduction <add>, %71, %cst_42 [1] : vector<16x32xf32> to vector<16xf32>
      %73 = vector.shape_cast %72 : vector<16xf32> to vector<16x1xf32>
      %cst_43 = arith.constant 3.200000e+01 : f32
      %74 = vector.broadcast %cst_43 : f32 to vector<16x1xf32>
      %75 = arith.divf %73, %74 : vector<16x1xf32>
      %76 = vector.broadcast %66 : vector<16x1xf32> to vector<16x32xf32>
      %77 = arith.subf %62, %76 : vector<16x32xf32>
      %cst_44 = arith.constant 9.99999974E-6 : f32
      %78 = vector.broadcast %cst_44 : f32 to vector<16x1xf32>
      %79 = arith.addf %75, %78 : vector<16x1xf32>
      %80 = math.rsqrt %79 : vector<16x1xf32>
      %81 = vector.broadcast %80 : vector<16x1xf32> to vector<16x32xf32>
      %82 = arith.mulf %77, %81 : vector<16x32xf32>
      %c0_45 = arith.constant 0 : index
      %c0_46 = arith.constant 0 : index
      %83 = vector.load %arg11[%c0_45, %c0_46] : memref<1x32xf32, #tpu.memory_space<vmem>>, vector<1x32xf32>
      %84 = vector.broadcast %83 : vector<1x32xf32> to vector<16x32xf32>
      %85 = arith.mulf %82, %84 : vector<16x32xf32>
      %c0_47 = arith.constant 0 : index
      %c0_48 = arith.constant 0 : index
      %86 = vector.load %arg12[%c0_47, %c0_48] : memref<1x32xf32, #tpu.memory_space<vmem>>, vector<1x32xf32>
      %87 = vector.broadcast %86 : vector<1x32xf32> to vector<16x32xf32>
      %88 = arith.addf %85, %87 : vector<16x32xf32>
      %c0_49 = arith.constant 0 : index
      %c0_50 = arith.constant 0 : index
      %89 = vector.load %arg13[%c0_49, %c0_50] : memref<16x32xf32, #tpu.memory_space<vmem>>, vector<16x32xf32>
      tpu.vector_store %arg13[%c0_49, %c0_50], %88 {strides = array<i32>} : memref<16x32xf32, #tpu.memory_space<vmem>>, vector<16x32xf32>,
    } else {
    }
    return
  }
  func.func @transform_0(%arg0: i32, %arg1: i32) -> (i32, i32) {
    %c0_i32 = arith.constant 0 : i32
    %c0_i32_0 = arith.constant 0 : i32
    return %arg0, %c0_i32 : i32, i32
  }
  func.func @transform_1(%arg0: i32, %arg1: i32) -> (i32, i32, i32) {
    %c0_i32 = arith.constant 0 : i32
    %c0_i32_0 = arith.constant 0 : i32
    %c0_i32_1 = arith.constant 0 : i32
    return %arg1, %c0_i32, %c0_i32_0 : i32, i32, i32
  }
  func.func @transform_2(%arg0: i32, %arg1: i32) -> (i32, i32, i32) {
    %c0_i32 = arith.constant 0 : i32
    %c0_i32_0 = arith.constant 0 : i32
    %c0_i32_1 = arith.constant 0 : i32
    return %arg1, %c0_i32, %c0_i32_0 : i32, i32, i32
  }
  func.func @transform_3(%arg0: i32, %arg1: i32) -> (i32, i32, i32) {
    %c0_i32 = arith.constant 0 : i32
    %c0_i32_0 = arith.constant 0 : i32
    %c0_i32_1 = arith.constant 0 : i32
    return %arg1, %c0_i32, %c0_i32_0 : i32, i32, i32
  }
  func.func @transform_4(%arg0: i32, %arg1: i32) -> (i32, i32, i32) {
    %c0_i32 = arith.constant 0 : i32
    %c0_i32_0 = arith.constant 0 : i32
    %c0_i32_1 = arith.constant 0 : i32
    return %arg1, %c0_i32, %c0_i32_0 : i32, i32, i32
  }
  func.func @transform_5(%arg0: i32, %arg1: i32) -> (i32, i32, i32) {
    %c0_i32 = arith.constant 0 : i32
    %c0_i32_0 = arith.constant 0 : i32
    %c0_i32_1 = arith.constant 0 : i32
    return %arg1, %c0_i32, %c0_i32_0 : i32, i32, i32
  }
  func.func @transform_6(%arg0: i32, %arg1: i32) -> (i32, i32, i32) {
    %c0_i32 = arith.constant 0 : i32
    %c0_i32_0 = arith.constant 0 : i32
    %c0_i32_1 = arith.constant 0 : i32
    return %arg1, %c0_i32, %c0_i32_0 : i32, i32, i32
  }
  func.func @transform_7(%arg0: i32, %arg1: i32) -> (i32, i32, i32) {
    %c0_i32 = arith.constant 0 : i32
    %c0_i32_0 = arith.constant 0 : i32
    %c0_i32_1 = arith.constant 0 : i32
    return %arg1, %c0_i32, %c0_i32_0 : i32, i32, i32
  }
  func.func @transform_8(%arg0: i32, %arg1: i32) -> (i32, i32) {
    %c0_i32 = arith.constant 0 : i32
    %c0_i32_0 = arith.constant 0 : i32
    %c0_i32_1 = arith.constant 0 : i32
    return %c0_i32, %c0_i32_0 : i32, i32
  }
  func.func @transform_9(%arg0: i32, %arg1: i32) -> (i32, i32) {
    %c0_i32 = arith.constant 0 : i32
    %c0_i32_0 = arith.constant 0 : i32
    %c0_i32_1 = arith.constant 0 : i32
    return %c0_i32, %c0_i32_0 : i32, i32
  }
  func.func @transform_10(%arg0: i32, %arg1: i32) -> (i32, i32) {
    %c0_i32 = arith.constant 0 : i32
    %c0_i32_0 = arith.constant 0 : i32
    %c0_i32_1 = arith.constant 0 : i32
    return %c0_i32, %c0_i32_0 : i32, i32
  }
  func.func @transform_11(%arg0: i32, %arg1: i32) -> (i32, i32) {
    %c0_i32 = arith.constant 0 : i32
    %c0_i32_0 = arith.constant 0 : i32
    return %arg0, %c0_i32 : i32, i32
  }
}

</mosaic_0001>

<bundles_post_ra>
// kernel: tpu_custom_call.1
= control target key start
LH: loop header
LB: loop body
LE: loop exit
PB: predicated region body
PF: predicated region fallthrough
CT: control target
= control target key end

     0   :  { %s1670_s0 = inlined_call_operand.vmem [shape: f32[16,32], index: 0, kind: input, shape index: {}]   ;;  %s1671_s1 = inlined_call_operand.vmem [shape: bf16[8,32,4], index: 1, kind: input, shape index: {}]   ;;  %s1672_s2 = inlined_call_operand.vmem [shape: f32[8,1,4], index: 2, kind: input, shape index: {}]   ;;  %s1673_s3 = inlined_call_operand.vmem [shape: bf16[8,32,4], index: 3, kind: input, shape index: {}]   ;;  %s1674_s4 = inlined_call_operand.vmem [shape: f32[8,1,4], index: 4, kind: input, shape index: {}]   ;;  %s1675_s5 = inlined_call_operand.vmem [shape: bf16[8,32,4], index: 5, kind: input, shape index: {}]   ;;  %s1676_s6 = inlined_call_operand.vmem [shape: f32[8,1,4], index: 6, kind: input, shape index: {}]   ;;  %s1677_s7 = inlined_call_operand.vmem [shape: bf16[8,4,32], index: 7, kind: input, shape index: {}]   ;;  %s1678_s8 = inlined_call_operand.vmem [shape: f32[1,32], index: 8, kind: input, shape index: {}]   ;;  %s1679_s9 = inlined_call_operand.vmem [shape: f32[1,32], index: 9, kind: input, shape index: {}]   ;;  %s1680_s10 = inlined_call_operand.vmem [shape: f32[1,32], index: 10, kind: input, shape index: {}]   ;;  %s1681_s11 = inlined_call_operand.hbm [shape: f32[16,32], index: 11, kind: output, shape index: {}]  }
   0x1   :  { %1684 = sst [smem:[#allocation8_spill]] %s1671_s1 }
   0x2   :  { %1685 = sst [smem:[#allocation9_spill]] %s1681_s11 }
   0x3   :  { %16 = vsyncpa [#allocation4], 0  ;;  %s1486_s17 = smov 0   ;;  %s1488_s18 = smov 0  }
   0x4   :  { %s1490_s19 = smov 0  }
   0x5 LB: > { %1686 = sst [smem:[#allocation6_spill]] %s1414_s18  ;;  %s31_s21 = sadd.s32 1, %s1414_s18  ;;  %s1418_s19 = sphi %s1490_s19, %s22_s19   ;;  %s1414_s18 = sphi %s1488_s18, %s1694_s18   ;;  %s1410_s17 = sphi %s1486_s17, %s1693_s17  }
   0x6   : > { %p32_p0 = scmp.ge.s32.totalorder %s31_s21, 8  ;;  %p1202_p1 = scmp.ge.s32.totalorder %s1418_s19, 1 }
   0x7   : > { %p414_p2 = scmp.lt.s32.totalorder %s1418_s19, 9 }
   0x8   : > { %s1696_s21 = smov (%p32_p0, %s31_s21), 0 }
   0x9   : > { %1687 = sst [smem:[#allocation7_spill]] %s1696_s21  ;;  %p415_p3 = pnand %p1202_p1, %p414_p2 }
   0xa   : > { %p483_p4 = scmp.lt.s32.totalorder (!%p415_p3), %s1410_s17, 7  ;;  %s1688_s1 = sld [smem:[#allocation8_spill]] (!%p415_p3) }
   0xb   : > { %418 = sbr.rel (%p415_p3) target bundleno = 1581 (0x62d), region = 64  ;;  %p1210_p5 = scmp.ne.s32.totalorder (!%p415_p3), %s1410_s17, 0 }
  0x12   : > { %s1509_s22 = scalar_select %p483_p4, %s1410_s17, 7 }
  0x13   : > { %516 = sbr.rel (%p1210_p5) target bundleno = 26 (0x1a), region = 68  ;;  %vm517_vm0 = vcmask (!%p1210_p5), 261120   ;;  %v1420_v0 = vmov (!%p1210_p5), 0.0  }
  0x14   : > { %s1236_s23 = sshll.u32 %s1509_s22, 4  ;;  %s498_s16 = scalar_lea.vmem %s1674_s4, %s1509_s22  ;;  %518 = vst.msk [vmem:[#allocation2] sm:$0xff] (!%p1210_p5), %vm517_vm0, %v1420_v0  ;;  %519 = vst.msk [vmem:[#allocation2 + $0x8] sm:$0xff] (!%p1210_p5), %vm517_vm0, %v1420_v0 }
  0x15   : > { %s487_s29 = scalar_lea.vmem %s1688_s1, %s1236_s23  ;;  %s495_s13 = scalar_lea.vmem %s1673_s3, %s1236_s23 }
  0x16   : > { %s1529_s18 = scalar_lea.vmem %s1675_s5, %s1236_s23  ;;  %s506_s25 = scalar_lea.vmem %s1676_s6, %s1509_s22 }
  0x17   : > { %s1209_s26 = sshll.u32 %s1509_s22, 1 }
  0x18   : > { %s1539_s1 = scalar_lea.vmem %s1677_s7, %s1209_s26 }
  0x1a PF: > { %v1348_v1 = vld [vmem:[%s495_s13] sm:$0xff]   ;;  %v1421_v2 = vmov 0.0   ;;  %v1350_v4 = vld [vmem:[%s495_s13 + $0x8] sm:$0xff]   ;;  %vm1422_vm1 = vmmov 0   ;;  %vm546_vm2 = vcmask 261120   ;;  %s1689_s12 = scalar_lea.vmem %s1672_s2, %s1509_s22  ;;  %vm727_vm3 = vcmask 31744  }
  0x1b   : > { %1266 = vmatprep.subr.bf16.mxu1 %v1421_v2  ;;  %1258 = vmatprep.subr.bf16.mxu0 %v1421_v2  ;;  %v1349_v3 = vld [vmem:[%s487_s29] sm:$0xff]   ;;  %v1555_v6 = vld [vmem:[%s1670_s0 + $0x8] sm:$0xff]  ;;  %vm848_vm4 = vcmask 1043456   ;;  %vm820_vm5 = vcmask 64512   ;;  %vm945_vm6 = vcmask 1041408   ;;  %p1228_p6 = scmp.ne.s32.totalorder %s1410_s17, 7 }
  0x1c   : > { %1267 = vmatpush3.bf16.msra.mxu1 %v1348_v1  ;;  %1270 = vmatprep.mubr.msk.bf16.mxu1 %vm1422_vm1, %v1421_v2  ;;  %v1550_v5 = vld [vmem:[%s1670_s0] sm:$0xff]  ;;  %v1351_v7 = vld [vmem:[%s487_s29 + $0x8] sm:$0xff]  }
  0x1d   : > { %1268 = vmatprep.subr.bf16.mxu1 %v1421_v2  ;;  %1259 = vmatpush3.bf16.msra.mxu0 %v1349_v3  ;;  %v522_v8 = vpack.c.bf16 %v1555_v6, %v1550_v5  ;;  %v1352_v9 = vld [vmem:[%s1529_s18] sm:$0xff]   ;;  %v1353_v10 = vld [vmem:[%s1529_s18 + $0x8] sm:$0xff]  }
  0x1e   : > { %1260 = vmatprep.subr.bf16.mxu0 %v1421_v2  ;;  %1262 = vmatprep.mubr.msk.bf16.mxu0 %vm1422_vm1, %v1421_v2  ;;  %v1215_v11 = vld [vmem:[%s498_s16] ss:$0 sm:$0xff] }
  0x1f   : > { %v1211_v12 = vld [vmem:[%s1689_s12] ss:$0 sm:$0xff] }
  0x20   : > { %1269 = vmatpush3.bf16.msra.mxu1 %v1350_v4  ;;  %v1219_v30 = vld [vmem:[%s506_s25] ss:$0 sm:$0xff] }
  0x21   : > { %1261 = vmatpush3.bf16.msra.mxu0 %v1351_v7  ;;  %1282 = vmatprep.subr.bf16.mxu1 %v1421_v2 }
  0x22   : > { %1274 = vmatprep.subr.bf16.mxu0 %v1421_v2 }
  0x23   : > { %1271 = vmatmul.mubr.msk.bf16.vlgmr.msra.gmra.mrb[0].mxu1 %vm546_vm2, %v522_v8 }
  0x24   : > { %1263 = vmatmul.mubr.msk.bf16.vlgmr.msra.gmra.mrb[0].mxu0 %vm546_vm2, %v522_v8  ;;  %1284 = vmatprep.mubr.msk.bf16.mxu1 %vm1422_vm1, %v1421_v2 }
  0x25   : > { %1275 = vmatpush3.bf16.msra.mxu0 %v1352_v9  ;;  %1278 = vmatprep.mubr.msk.bf16.mxu0 %vm1422_vm1, %v1421_v2 }
  0x26   : > { %1276 = vmatprep.subr.bf16.mxu0 %v1421_v2 }
  0x29   : > { %1277 = vmatpush3.bf16.msra.mxu0 %v1353_v10 }
  0x2a   : > { %1288 = vmatprep.subr.bf16.mxu0 %v1421_v2 }
  0x2c   : > { %1279 = vmatmul.mubr.msk.bf16.vlgmr.msra.gmra.mrb[4].mxu0 %vm546_vm2, %v522_v8 }
  0x2d   : > { %1290 = vmatprep.mubr.msk.bf16.mxu0 %vm1422_vm1, %v1421_v2 }
  0xf6   : > { %v648_v13 = vpop.f32.mrb[0].mxu1 }
  0xf7   : > { %v649_v14 = vadd.f32 %v1215_v11, %v648_v13  ;;  %v1272_v15 = vpop.f32.mrb[1].mxu1  ;;  %v584_v16 = vpop.f32.mrb[0].mxu0 }
  0xf8   : > { %v651_v17 = vpop.f32.mrb[2].mxu1  ;;  %v585_v18 = vadd.f32 %v1211_v12, %v584_v16  ;;  %v1264_v19 = vpop.f32.mrb[1].mxu0 }
  0xf9   : > { %v723_v20 = vpack.c.bf16 %v649_v14, %v649_v14  ;;  %v652_v21 = vadd.f32 %v1215_v11, %v651_v17  ;;  %v1273_v22 = vpop.f32.mrb[3].mxu1  ;;  %v587_v23 = vpop.f32.mrb[2].mxu0  ;;  %v941_v11 = vld [vmem:[%s1539_s1] sm:$0x3] }
  0xfa   : > { %v1265_v24 = vpop.f32.mrb[3].mxu0  ;;  %v719_v27 = vmul.f32 0.5, %v585_v18  ;;  %v588_v28 = vadd.f32 %v1211_v12, %v587_v23  ;;  %v947_v12 = vsel %vm945_vm6, %v941_v11, 0  ;;  %v938_v22 = vld [vmem:[#allocation2] sm:$0xff]  ;;  %v939_v23 = vld [vmem:[#allocation2 + $0x8] sm:$0xff] }
  0xfb   : > { %v732_v25 = vsel %vm727_vm3, %v723_v20, 0  ;;  %v724_v26 = vpack.c.bf16 %v652_v21, %v652_v21 }
  0xfc   : > { %1283 = vmatpush3.bf16.xpose.msra.mxu1 %v732_v25  ;;  %v721_v31 = vpack.c.bf16 %v719_v27, %v719_v27  ;;  %v720_v32 = vmul.f32 0.5, %v588_v28 }
  0xfd   : > { %v778_v29 = vsel %vm727_vm3, %v724_v26, 0  ;;  %1294 = vmatprep.subr.bf16.mxu1 %v1421_v2 }
  0xfe   : > { %1289 = vmatpush3.bf16.xpose.msra.mxu0 %v778_v29  ;;  %v722_v40 = vpack.c.bf16 %v720_v32, %v720_v32 }
  0xff   : > { %v712_v33 = vpop.f32.mrb[4].mxu0  ;;  %1300 = vmatprep.subr.bf16.mxu0 %v1421_v2 }
 0x100   : > { %v713_v34 = vadd.f32 %v1219_v30, %v712_v33  ;;  %v1280_v35 = vpop.f32.mrb[5].mxu0 }
 0x101   : > { %v715_v36 = vpop.f32.mrb[6].mxu0 }
 0x102   : > { %v725_v37 = vpack.c.bf16 %v713_v34, %v713_v34  ;;  %v716_v38 = vadd.f32 %v1219_v30, %v715_v36  ;;  %v1281_v39 = vpop.f32.mrb[7].mxu0  ;;  %v1229_v30 = vld [vmem:[%s1678_s8] ss:$0 sm:$0xff] (!%p1228_p6) }
 0x103   : > { %1285 = vmatmul.mubr.msk.bf16.vlgmr.msra.gmra.mrb[4].mxu1 %vm727_vm3, %v721_v31 }
 0x104   : > { %v850_v41 = vsel %vm848_vm4, %v725_v37, 0  ;;  %v726_v42 = vpack.c.bf16 %v716_v38, %v716_v38  ;;  %1296 = vmatprep.mubr.msk.bf16.mxu1 %vm1422_vm1, %v1421_v2 }
 0x105   : > { %1291 = vmatmul.mubr.msk.bf16.vlgmr.msra.gmra.mrb[8].mxu0 %vm727_vm3, %v722_v40  ;;  %1295 = vmatpush3.bf16.msra.mxu1 %v850_v41 }
 0x106   : > { %v896_v43 = vsel %vm848_vm4, %v726_v42, 0  ;;  %1302 = vmatprep.mubr.msk.bf16.mxu0 %vm1422_vm1, %v1421_v2  ;;  %1306 = vmatprep.subr.bf16.mxu1 %v1421_v2 }
 0x107   : > { %1301 = vmatpush3.bf16.msra.mxu0 %v896_v43 }
 0x1d6   : > { %v768_v44 = vpop.f32.mrb[4].mxu1 }
 0x1d7   : > { %v1286_v45 = vpop.f32.mrb[5].mxu1  ;;  %v821_v46 = vsel %vm820_vm5, %v768_v44, -inf }
 0x1d8   : > { %822 = vmax.xlane.f32.xlu0 %v821_v46  ;;  %v771_v47 = vpop.f32.mrb[6].mxu1  ;;  %v814_v48 = vpop.f32.mrb[8].mxu0 }
 0x1d9   : > { %v1287_v49 = vpop.f32.mrb[7].mxu1  ;;  %v1292_v50 = vpop.f32.mrb[9].mxu0  ;;  %v824_v53 = vsel %vm820_vm5, %v814_v48, -inf }
 0x1da   : > { %v817_v51 = vpop.f32.mrb[10].mxu0 }
 0x1db   : > { %v1293_v52 = vpop.f32.mrb[11].mxu0 }
 0x1dc   : > { %825 = vmax.xlane.f32.xlu0 %v824_v53  ;;  %v1230_v53 = vld [vmem:[%s1679_s9] ss:$0 sm:$0xff] (!%p1228_p6) }
 0x265   : > { %v823_v54 = vpop.xlane.xlu0 %822 }
 0x266   : > { %v827_v55 = vsub.f32 %v768_v44, %v823_v54 }
 0x268   : > { %v829_v56 = vmul.f32 1.442695, %v827_v55  ;;  %v1231_v55 = vld [vmem:[%s1680_s10] ss:$0 sm:$0xff] (!%p1228_p6) }
 0x269   : > { %v826_v57 = vpop.xlane.xlu0 %825 }
 0x26a   : > { %1354 = vpow2.f32 %v829_v56  ;;  %v828_v58 = vsub.f32 %v814_v48, %v826_v57 }
 0x26c   : > { %v831_v59 = vmul.f32 1.442695, %v828_v58 }
 0x26e   : > { %1356 = vpow2.f32 %v831_v59 }
 0x274   : > { %v1355_v60 = vpop.eup %1354 }
 0x275   : > { %v833_v61 = vsel %vm820_vm5, %v1355_v60, 0.0 }
 0x276   : > { %834 = vadd.xlane.f32.xlu1 %v833_v61 }
 0x278   : > { %v1357_v62 = vpop.eup %1356 }
 0x279   : > { %v836_v63 = vsel %vm820_vm5, %v1357_v62, 0.0 }
 0x27a   : > { %837 = vadd.xlane.f32.xlu1 %v836_v63 }
 0x303   : > { %v835_v0 = vpop.xlane.xlu1 %834 }
 0x304   : > { %1358 = vrcp.f32 %v835_v0 }
 0x307   : > { %v838_v1 = vpop.xlane.xlu1 %837 }
 0x308   : > { %1360 = vrcp.f32 %v838_v1 }
 0x30e   : > { %v1359_v3 = vpop.eup %1358 }
 0x30f   : > { %v841_v4 = vmul.f32 %v1359_v3, %v1355_v60 }
 0x311   : > { %v843_v7 = vpack.c.bf16 %v841_v4, %v841_v4 }
 0x312   : > { %v1361_v8 = vpop.eup %1360 }
 0x313   : > { %v842_v9 = vmul.f32 %v1361_v8, %v1357_v62  ;;  %1297 = vmatmul.mubr.msk.bf16.vlgmr.msra.gmra.mrb[8].mxu1 %vm820_vm5, %v843_v7 }
 0x314   : > { %1308 = vmatprep.mubr.msk.bf16.mxu1 %vm1422_vm1, %v1421_v2  ;;  %1307 = vmatpush3.bf16.msra.mxu1 %v947_v12 }
 0x315   : > { %v844_v10 = vpack.c.bf16 %v842_v9, %v842_v9 }
 0x317   : > { %1303 = vmatmul.mubr.msk.bf16.vlgmr.msra.gmra.mrb[12].mxu0 %vm820_vm5, %v844_v10 }
 0x3e6   : > { %v886_v13 = vpop.f32.mrb[8].mxu1 }
 0x3e7   : > { %v1298_v14 = vpop.f32.mrb[9].mxu1 }
 0x3e8   : > { %v889_v15 = vpop.f32.mrb[10].mxu1 }
 0x3e9   : > { %v1299_v16 = vpop.f32.mrb[11].mxu1 }
 0x3ea   : > { %v932_v17 = vpop.f32.mrb[12].mxu0 }
 0x3eb   : > { %v940_v18 = vpack.c.bf16 %v932_v17, %v886_v13  ;;  %v1304_v19 = vpop.f32.mrb[13].mxu0 }
 0x3ec   : > { %v935_v20 = vpop.f32.mrb[14].mxu0 }
 0x3ed   : > { %v1305_v21 = vpop.f32.mrb[15].mxu0  ;;  %1309 = vmatmul.mubr.msk.bf16.vlgmr.msra.gmra.mrb[12].mxu1 %vm727_vm3, %v940_v18 }
 0x4bf   : > { %997 = sbr.rel (%p1228_p6) target bundleno = 1549 (0x60d), region = 72 }
 0x4c0   : > { %v983_v2 = vpop.f32.mrb[12].mxu1 }
 0x4c1   : > { %v990_v24 = vadd.f32 %v983_v2, %v938_v22  ;;  %v1310_v25 = vpop.f32.mrb[13].mxu1 }
 0x4c2   : > { %v986_v26 = vpop.f32.mrb[14].mxu1 }
 0x4c3   : > { %992 = vst.msk [vmem:[#allocation2] sm:$0xff] %vm546_vm2, %v990_v24  ;;  %v991_v27 = vadd.f32 %v986_v26, %v939_v23  ;;  %v1311_v28 = vpop.f32.mrb[15].mxu1 }
 0x4c5   : > { %993 = vst.msk [vmem:[#allocation2 + $0x8] sm:$0xff] %vm546_vm2, %v991_v27 }
 0x4ca   : > { %v998_v29 = vld [vmem:[#allocation2] sm:$0xff] }
 0x4cb   : > { %v1007_v32 = vadd.f32 %v1229_v30, %v998_v29 }
 0x4cc   : > { %v999_v31 = vld [vmem:[#allocation2 + $0x8] sm:$0xff] }
 0x4cd   : > { %v1008_v33 = vadd.f32 %v1229_v30, %v999_v31  ;;  %v1009_v34 = vadd.f32 %v1007_v32, %v1550_v5 }
 0x4cf   : > { %v1010_v35 = vadd.f32 %v1008_v33, %v1555_v6  ;;  %v1011_v36 = vsel %vm546_vm2, %v1009_v34, 0.0 }
 0x4d0   : > { %1012 = vadd.xlane.f32.xlu0 %v1011_v36 }
 0x4d1   : > { %v1014_v37 = vsel %vm546_vm2, %v1010_v35, 0.0 }
 0x4d4   : > { %1015 = vadd.xlane.f32.xlu0 %v1014_v37 }
 0x55d   : > { %v1013_v38 = vpop.xlane.xlu0 %1012 }
 0x55e   : > { %v1018_v39 = vmul.f32 0.03125, %v1013_v38 }
 0x560   : > { %v1020_v40 = vsub.f32 %v1009_v34, %v1018_v39 }
 0x561   : > { %v1016_v41 = vpop.xlane.xlu0 %1015 }
 0x562   : > { %v1019_v42 = vmul.f32 0.03125, %v1016_v41  ;;  %v1022_v43 = vmul.f32 %v1020_v40, %v1020_v40 }
 0x564   : > { %v1021_v44 = vsub.f32 %v1010_v35, %v1019_v42  ;;  %v1024_v45 = vsel %vm546_vm2, %v1022_v43, 0.0 }
 0x565   : > { %1025 = vadd.xlane.f32.xlu1 %v1024_v45 }
 0x566   : > { %v1023_v46 = vmul.f32 %v1021_v44, %v1021_v44 }
 0x568   : > { %v1027_v5 = vsel %vm546_vm2, %v1023_v46, 0.0 }
 0x569   : > { %1028 = vadd.xlane.f32.xlu1 %v1027_v5 }
 0x5f2   : > { %v1026_v6 = vpop.xlane.xlu1 %1025 }
 0x5f3   : > { %v1030_v47 = vmul.f32 0.03125, %v1026_v6 }
 0x5f5   : > { %v1032_v48 = vadd.f32 1e-05, %v1030_v47 }
 0x5f6   : > { %v1029_v49 = vpop.xlane.xlu1 %1028 }
 0x5f7   : > { %1362 = vrsqrt.f32 %v1032_v48  ;;  %v1031_v50 = vmul.f32 0.03125, %v1029_v49 }
 0x5f9   : > { %v1033_v51 = vadd.f32 1e-05, %v1031_v50 }
 0x5fb   : > { %1364 = vrsqrt.f32 %v1033_v51 }
 0x601   : > { %v1363_v52 = vpop.eup %1362 }
 0x602   : > { %v1036_v54 = vmul.f32 %v1363_v52, %v1020_v40 }
 0x604   : > { %v1045_v56 = vmul.f32 %v1230_v53, %v1036_v54 }
 0x605   : > { %v1365_v57 = vpop.eup %1364 }
 0x606   : > { %v1054_v58 = vadd.f32 %v1231_v55, %v1045_v56  ;;  %v1037_v59 = vmul.f32 %v1365_v57, %v1021_v44 }
 0x608   : > { %1056 = vst.msk [vmem:[#allocation3] sm:$0xff] %vm546_vm2, %v1054_v58  ;;  %v1046_v60 = vmul.f32 %v1230_v53, %v1037_v59 }
 0x60a   : > { %v1055_v61 = vadd.f32 %v1231_v55, %v1046_v60 }
 0x60c   : > { %1057 = vst.msk [vmem:[#allocation3 + $0x8] sm:$0xff] %vm546_vm2, %v1055_v61 }
 0x60d PF: > { %s1690_s25 = sadd.s32 4294967295, %s1418_s19   ;;  %s1423_s28 = smov [#allocation3]  }
 0x60e   : > { %p1635_p7 = scmp.eq.s32.totalorder %s1690_s25, 7  ;;  %s1067_s11 = sshll.u32 %s1423_s28, 4  ;;  %s1068_s11 = int_to_ptr.vmem [resolvable:$true] %s1067_s11 }
 0x60f   : > { %s1366_s20 = scalar_lea.vmem %s1068_s11, 256  ;;  %p1373_p11 = scmp.lt.s32.totalorder %s1068_s11, %s1068_s11 }
 0x610   : > { %p1367_p8 = scmp.ne.s32.totalorder %s1068_s11, %s1366_s20  ;;  %p1374_p12 = scmp.lt.s32.totalorder %s1366_s20, %s1366_s20 }
 0x612   : > { %p1368_p9 = pnand %p1367_p8, %p1635_p7  ;;  %p1375_p13 = por %p1374_p12, %p1373_p11 }
 0x614   : > { %p1369_p10 = pneg %p1368_p9 }
 0x616   : > { %p1376_p0 = pnand %p1375_p13, %p1369_p10 }
 0x618   : > { %1379 = shalt.err (!%p1376_p0)
}
 0x619   : > { %s1692_s26 = sld [smem:[#allocation9_spill]] }
 0x61f   : > { %s1380_s29 = scalar_lea.hbm %s1692_s26, 256 }
 0x620   : > { %p1381_p1 = scmp.ne.s32.totalorder %s1692_s26, %s1380_s29  ;;  %p1386_p4 = scmp.lt.u32.totalorder %s1380_s29, %s1692_s26 }
 0x622   : > { %p1382_p2 = pnand %p1381_p1, %p1635_p7 }
 0x624   : > { %p1383_p3 = pneg %p1382_p2 }
 0x626   : > { %p1388_p5 = pnand %p1386_p4, %p1383_p3 }
 0x628   : > { %1391 = shalt.err (!%p1388_p5)
}
 0x629   : > { %s1424_s14 = smov 128   ;;  %s1425_s1 = smov 8  }
 0x62a   : > { %1313 = dma.vmem_to_hbm [thread:$0]  (%p1635_p7), %s1068_s11, 256, %s1692_s26, [#allocation4], %s1424_s14, %s1424_s14, %s1425_s1  }
 0x62b   : > { %1405 = dma.done.wait (%p1635_p7), [#allocation4], 256  }
 0x62c   : > { %1407 = vsyncadd (%p1635_p7), [#allocation4], 4294967040 }
 0x62d PF: > { %s22_s19 = sadd.s32 1, %s1418_s19   ;;  %s1693_s17 = sld [smem:[#allocation6_spill]] }
 0x62e   : > { %p19_p6 = scmp.ge.s32.totalorder %s22_s19, 10   ;;  %s1694_s18 = sld [smem:[#allocation7_spill]] }
 0x630   :  { %21 = sbr.rel (!%p19_p6) target bundleno = 5 (0x5), region = 121 }
 0x637   :  { %1083 = vsyncpa [#allocation4], 1 }
 0x638   :  { %1085 = vsyncpa [#allocation4 + $0x1], 1 }

</bundles_post_ra>
